<compile_context>
chip_gen: v5e
topology: v5e:2x2
jax: 0.10.0
libtpu: 0.0.40
codegen_flags: <defaults>
</compile_context>

<pallas_src>
import functools

import jax
import jax.numpy as jnp
from jax.experimental import pallas as pl
from jax.experimental.pallas import tpu as pltpu


def _masked_bce_kernel(pm_ref, pred_ref, label_ref, vm_ref, e_ref,
                       out_ref, acc_ref, *, n_rows, ragged):
    b = pl.program_id(0)
    r = pl.program_id(1)
    nr = pl.num_programs(1)

    @pl.when(r == 0)
    def _init():
        acc_ref[0] = 0.0          # per-batch numerator accumulator (SMEM)

    pm_b = pm_ref[b]              # scalar pairwise mask for this batch

    # Skip all compute for masked-out batches (DMA still streams; cheap gate).
    @pl.when(pm_b != 0.0)
    def _compute():
        p = pred_ref[0].astype(jnp.float32)     # (TR, GM)
        y = label_ref[0].astype(jnp.float32)    # (TR, GM)
        vm = vm_ref[0].astype(jnp.float32)      # (TR, G)

        if ragged:
            # Last row-block may extend past NG: neutralize garbage rows before
            # the logs (avoids NaN propagation) and zero their weights.
            tr = p.shape[0]
            row_ids = jax.lax.broadcasted_iota(jnp.int32, (tr, 1), 0) + r * tr
            valid = row_ids < n_rows            # (TR, 1) bool
            p = jnp.where(valid, p, 0.5)
            y = jnp.where(valid, y, 0.0)
            vm = jnp.where(valid, vm, 0.0)

        # Elementwise BCE with torch's -100 clamp on the log terms.
        log_p = jnp.maximum(jnp.log(p), -100.0)
        log_1mp = jnp.maximum(jnp.log(1.0 - p), -100.0)
        bce = -(y * log_p + (1.0 - y) * log_1mp)          # (TR, GM)

        # One MXU contraction: E already carries the per-batch seq mask, so this
        # computes sum_m bce[row, g*M+m] * seq_mask[m] for every (row, g).
        rg = jnp.dot(bce, e_ref[0], preferred_element_type=jnp.float32)  # (TR, G)

        acc_ref[0] = acc_ref[0] + jnp.sum(rg * vm) * pm_b

    @pl.when(r == nr - 1)
    def _fin():
        # Lane-dense store of the per-batch numerator (wrapper reads lane 0).
        out_ref[...] = jnp.full(out_ref.shape, acc_ref[0], out_ref.dtype)


def masked_bce_loss(pred, label, pairwise_mask, vertex_mask, seq_mask,
                    *, target_block_bytes=4 * 1024 * 1024):
    B, N, M = pred.shape

    # Lane-dense regrouping: pack G consecutive vertex rows into the lane axis
    # so the trailing dim is a multiple of 128 when M is small.
    if M < 128 and 128 % M == 0 and N % (128 // M) == 0:
        G = 128 // M
    else:
        G = 1
    NG = N // G
    GM = G * M

    # Contiguous reshapes (free); masks are tiny so casting them here is cheap.
    pred_g = pred.reshape(B, NG, GM)
    label_g = label.reshape(B, NG, GM)
    vm_g = vertex_mask.astype(jnp.float32).reshape(B, NG, G)
    pm = pairwise_mask.astype(jnp.float32).reshape(B)

    # Block-expansion matrix pre-scaled by the seq mask:
    #   E[b, g*M + m, g'] = seq_mask[b, m] if g == g' else 0   -> (B, GM, G)
    block_expand = jnp.kron(jnp.eye(G, dtype=jnp.float32),
                            jnp.ones((M, 1), jnp.float32))          # (GM, G)
    sm_rep = jnp.tile(seq_mask.astype(jnp.float32), (1, G))         # (B, GM)
    e_mat = block_expand[None, :, :] * sm_rep[:, :, None]           # (B, GM, G)

    # Row tile: largest multiple-of-8 divisor of NG that keeps one input block
    # near `target_block_bytes`.  If no such divisor exists, use a ragged last
    # block (masked in-kernel) instead of falling back to a huge TR = NG block.
    itemsize = jnp.dtype(pred.dtype).itemsize
    max_rows = max(8, target_block_bytes // max(1, GM * itemsize))
    if NG <= max_rows:
        TR, ragged = NG, False
    else:
        TR = 0
        t = (max_rows // 8) * 8
        while t >= 8:
            if NG % t == 0:
                TR = t
                break
            t -= 8
        if TR == 0:
            TR, ragged = (max_rows // 8) * 8, True
        else:
            ragged = False

    grid = (B, pl.cdiv(NG, TR))
    kernel = functools.partial(_masked_bce_kernel, n_rows=NG, ragged=ragged)

    out = pl.pallas_call(
        kernel,
        out_shape=jax.ShapeDtypeStruct((B, 1, 128), jnp.float32),
        grid_spec=pltpu.PrefetchScalarGridSpec(
            num_scalar_prefetch=0,
            grid=grid,
            in_specs=[
                # pairwise_mask: tiny, scalar-path reads only.
                pl.BlockSpec(memory_space=pltpu.MemorySpace.SMEM),
                # pred / label: pipelined (1, TR, GM) tiles (native dtype).
                pl.BlockSpec((1, TR, GM), lambda b, r: (b, r, 0)),
                pl.BlockSpec((1, TR, GM), lambda b, r: (b, r, 0)),
                # vertex mask, grouped to (B, NG, G).
                pl.BlockSpec((1, TR, G), lambda b, r: (b, r, 0)),
                # seq-mask-scaled block-expansion matrix (constant across r).
                pl.BlockSpec((1, GM, G), lambda b, r: (b, 0, 0)),
            ],
            # Per-batch partial numerator; resident across the r axis.
            out_specs=pl.BlockSpec((1, 1, 128), lambda b, r: (b, 0, 0)),
            scratch_shapes=[pltpu.SMEM((1,), jnp.float32)],
        ),
        compiler_params=pltpu.CompilerParams(
            dimension_semantics=("parallel", "arbitrary"),
            vmem_limit_bytes=48 * 1024 * 1024,
        ),
    )(pm, pred_g, label_g, vm_g, e_mat)

    num = jnp.sum(out[:, 0, 0])
    den = jnp.maximum(jnp.sum(pm), 1e-10)
    return num / den


def _reference(pred, label, pairwise_mask, vertex_mask, seq_mask):
    log_p = jnp.maximum(jnp.log(pred), -100.0)
    log_1mp = jnp.maximum(jnp.log(1.0 - pred), -100.0)
    bce = -(label * log_p + (1.0 - label) * log_1mp)
    mask = (vertex_mask[:, :, None] * seq_mask[:, None, :]
            * pairwise_mask[:, None, None])
    return jnp.sum(bce * mask) / jnp.maximum(jnp.sum(pairwise_mask), 1e-10)


if __name__ == "__main__":
    key = jax.random.PRNGKey(0)
    k1, k2, k3, k4, k5 = jax.random.split(key, 5)

    B, N, M = 2, 16, 16  # batch, vertex dim, sequence dim

    pred = jax.nn.sigmoid(jax.random.normal(k1, (B, N, M), dtype=jnp.float32))
    label = jax.random.bernoulli(k2, 0.5, (B, N, M)).astype(jnp.float32)
    vertex_mask = jax.random.bernoulli(k3, 0.7, (B, N)).astype(jnp.float32)
    seq_mask = jax.random.bernoulli(k4, 0.7, (B, M)).astype(jnp.float32)
    pairwise_mask = jax.random.bernoulli(k5, 0.8, (B,)).astype(jnp.float32)

    loss = masked_bce_loss(pred, label, pairwise_mask, vertex_mask, seq_mask)
    loss = jax.block_until_ready(loss)

    ref = _reference(pred, label, pairwise_mask, vertex_mask, seq_mask)
    assert jnp.allclose(loss, ref, rtol=1e-5, atol=1e-5), (loss, ref)

    print("KERNEL_OK")
</pallas_src>

<mosaic_0001>
module attributes {stable_mosaic.version = 11 : i64} {
  func.func @_masked_bce_kernel(%arg0: i32, %arg1: i32, %arg2: memref<2xf32, #tpu.memory_space<smem>>, %arg3: memref<1x2x128xf32, #tpu.memory_space<vmem>>, %arg4: memref<1x2x128xf32, #tpu.memory_space<vmem>>, %arg5: memref<1x2x8xf32, #tpu.memory_space<vmem>>, %arg6: memref<1x128x8xf32, #tpu.memory_space<vmem>>, %arg7: memref<1x1x128xf32, #tpu.memory_space<vmem>>, %arg8: memref<1xf32, #tpu.memory_space<smem>>) attributes {dimension_semantics = [#tpu.dimension_semantics<parallel>, #tpu.dimension_semantics<arbitrary>], iteration_bounds = array<i64: 2, 1>, scalar_prefetch = 0 : i64, scratch_operands = 1 : i64, tpu.core_type = #tpu.core_type<tc>, window_params = [{transform_indices = @transform_0, window_bounds = array<i64: 2>}, {transform_indices = @transform_1, window_bounds = array<i64: 1, 2, 128>}, {transform_indices = @transform_2, window_bounds = array<i64: 1, 2, 128>}, {transform_indices = @transform_3, window_bounds = array<i64: 1, 2, 8>}, {transform_indices = @transform_4, window_bounds = array<i64: 1, 128, 8>}, {transform_indices = @transform_5, window_bounds = array<i64: 1, 1, 128>}]} {
    %c0_i32 = arith.constant 0 : i32
    %0 = arith.cmpi eq, %arg1, %c0_i32 : i32
    %1 = arith.extui %0 : i1 to i32
    %c0_i32_0 = arith.constant 0 : i32
    %2 = arith.cmpi ne, %1, %c0_i32_0 : i32
    scf.if %2 {
      %cst_4 = arith.constant 0.000000e+00 : f32
      %c0 = arith.constant 0 : index
      %11 = memref.load %arg8[%c0] : memref<1xf32, #tpu.memory_space<smem>>
      memref.store %cst_4, %arg8[%c0] : memref<1xf32, #tpu.memory_space<smem>>
    } else {
    }
    %3 = arith.index_cast %arg0 : i32 to index
    %4 = memref.load %arg2[%3] : memref<2xf32, #tpu.memory_space<smem>>
    %cst = arith.constant 0.000000e+00 : f32
    %5 = arith.cmpf one, %4, %cst : f32
    %6 = arith.extui %5 : i1 to i32
    %c0_i32_1 = arith.constant 0 : i32
    %7 = arith.cmpi ne, %6, %c0_i32_1 : i32
    scf.if %7 {
      %c0 = arith.constant 0 : index
      %c0_4 = arith.constant 0 : index
      %c0_5 = arith.constant 0 : index
      %11 = vector.load %arg3[%c0, %c0_4, %c0_5] : memref<1x2x128xf32, #tpu.memory_space<vmem>>, vector<1x2x128xf32>
      %12 = vector.shape_cast %11 : vector<1x2x128xf32> to vector<2x128xf32>
      %c0_6 = arith.constant 0 : index
      %c0_7 = arith.constant 0 : index
      %c0_8 = arith.constant 0 : index
      %13 = vector.load %arg4[%c0_6, %c0_7, %c0_8] : memref<1x2x128xf32, #tpu.memory_space<vmem>>, vector<1x2x128xf32>
      %14 = vector.shape_cast %13 : vector<1x2x128xf32> to vector<2x128xf32>
      %c0_9 = arith.constant 0 : index
      %c0_10 = arith.constant 0 : index
      %c0_11 = arith.constant 0 : index
      %15 = vector.load %arg5[%c0_9, %c0_10, %c0_11] : memref<1x2x8xf32, #tpu.memory_space<vmem>>, vector<1x2x8xf32>
      %16 = vector.shape_cast %15 : vector<1x2x8xf32> to vector<2x8xf32>
      %17 = math.log %12 : vector<2x128xf32>
      %cst_12 = arith.constant -1.000000e+02 : f32
      %18 = vector.broadcast %cst_12 : f32 to vector<2x128xf32>
      %19 = arith.maximumf %17, %18 : vector<2x128xf32>
      %cst_13 = arith.constant 1.000000e+00 : f32
      %20 = vector.broadcast %cst_13 : f32 to vector<2x128xf32>
      %21 = arith.subf %20, %12 : vector<2x128xf32>
      %22 = math.log %21 : vector<2x128xf32>
      %cst_14 = arith.constant -1.000000e+02 : f32
      %23 = vector.broadcast %cst_14 : f32 to vector<2x128xf32>
      %24 = arith.maximumf %22, %23 : vector<2x128xf32>
      %25 = arith.mulf %14, %19 : vector<2x128xf32>
      %cst_15 = arith.constant 1.000000e+00 : f32
      %26 = vector.broadcast %cst_15 : f32 to vector<2x128xf32>
      %27 = arith.subf %26, %14 : vector<2x128xf32>
      %28 = arith.mulf %27, %24 : vector<2x128xf32>
      %29 = arith.addf %25, %28 : vector<2x128xf32>
      %cst_16 = arith.constant 0.000000e+00 : f32
      %30 = vector.broadcast %cst_16 : f32 to vector<2x128xf32>
      %31 = arith.subf %30, %29 : vector<2x128xf32>
      %c0_17 = arith.constant 0 : index
      %c0_18 = arith.constant 0 : index
      %c0_19 = arith.constant 0 : index
      %32 = vector.load %arg6[%c0_17, %c0_18, %c0_19] : memref<1x128x8xf32, #tpu.memory_space<vmem>>, vector<1x128x8xf32>
      %33 = vector.shape_cast %32 : vector<1x128x8xf32> to vector<128x8xf32>
      %cst_20 = arith.constant dense<0.000000e+00> : vector<2x8xf32>
      %34 = tpu.matmul %31, %33, %cst_20 {dimension_numbers = #tpu.dot_dimension_numbers<[1], [0], [0], [1], [0, 0, 1, 1], [], []>} : vector<2x128xf32>, vector<128x8xf32>, vector<2x8xf32> -> vector<2x8xf32>
      %c0_21 = arith.constant 0 : index
      %35 = memref.load %arg8[%c0_21] : memref<1xf32, #tpu.memory_space<smem>>
      %36 = arith.mulf %34, %16 : vector<2x8xf32>
      %37 = vector.shape_cast %36 : vector<2x8xf32> to vector<1x2x8xf32>
      %cst_22 = arith.constant dense<0.000000e+00> : vector<1xf32>
      %38 = vector.multi_reduction <add>, %37, %cst_22 [1, 2] : vector<1x2x8xf32> to vector<1xf32>
      %39 = vector.shape_cast %38 : vector<1xf32> to vector<1x1x1xf32>
      %40 = vector.extract %39[0, 0, 0] : f32 from vector<1x1x1xf32>
      %41 = arith.mulf %40, %4 : f32
      %42 = arith.addf %35, %41 : f32
      %c0_23 = arith.constant 0 : index
      %43 = memref.load %arg8[%c0_23] : memref<1xf32, #tpu.memory_space<smem>>
      memref.store %42, %arg8[%c0_23] : memref<1xf32, #tpu.memory_space<smem>>
    } else {
    }
    %c0_i32_2 = arith.constant 0 : i32
    %8 = arith.cmpi eq, %arg1, %c0_i32_2 : i32
    %9 = arith.extui %8 : i1 to i32
    %c0_i32_3 = arith.constant 0 : i32
    %10 = arith.cmpi ne, %9, %c0_i32_3 : i32
    scf.if %10 {
      %c0 = arith.constant 0 : index
      %11 = memref.load %arg8[%c0] : memref<1xf32, #tpu.memory_space<smem>>
      %12 = vector.broadcast %11 : f32 to vector<1x1x128xf32>
      %c0_4 = arith.constant 0 : index
      %c0_5 = arith.constant 0 : index
      %c0_6 = arith.constant 0 : index
      %13 = vector.load %arg7[%c0_4, %c0_5, %c0_6] : memref<1x1x128xf32, #tpu.memory_space<vmem>>, vector<1x1x128xf32>
      tpu.vector_store %arg7[%c0_4, %c0_5, %c0_6], %12 {strides = array<i32>} : memref<1x1x128xf32, #tpu.memory_space<vmem>>, vector<1x1x128xf32>,
    } else {
    }
    return
  }
  func.func @transform_0(%arg0: i32, %arg1: i32) -> i32 {
    %c0_i32 = arith.constant 0 : i32
    %c0_i32_0 = arith.constant 0 : i32
    return %c0_i32 : i32
  }
  func.func @transform_1(%arg0: i32, %arg1: i32) -> (i32, i32, i32) {
    %c0_i32 = arith.constant 0 : i32
    %c0_i32_0 = arith.constant 0 : i32
    return %arg0, %arg1, %c0_i32 : i32, i32, i32
  }
  func.func @transform_2(%arg0: i32, %arg1: i32) -> (i32, i32, i32) {
    %c0_i32 = arith.constant 0 : i32
    %c0_i32_0 = arith.constant 0 : i32
    return %arg0, %arg1, %c0_i32 : i32, i32, i32
  }
  func.func @transform_3(%arg0: i32, %arg1: i32) -> (i32, i32, i32) {
    %c0_i32 = arith.constant 0 : i32
    %c0_i32_0 = arith.constant 0 : i32
    return %arg0, %arg1, %c0_i32 : i32, i32, i32
  }
  func.func @transform_4(%arg0: i32, %arg1: i32) -> (i32, i32, i32) {
    %c0_i32 = arith.constant 0 : i32
    %c0_i32_0 = arith.constant 0 : i32
    %c0_i32_1 = arith.constant 0 : i32
    return %arg0, %c0_i32, %c0_i32_0 : i32, i32, i32
  }
  func.func @transform_5(%arg0: i32, %arg1: i32) -> (i32, i32, i32) {
    %c0_i32 = arith.constant 0 : i32
    %c0_i32_0 = arith.constant 0 : i32
    %c0_i32_1 = arith.constant 0 : i32
    return %arg0, %c0_i32, %c0_i32_0 : i32, i32, i32
  }
}

</mosaic_0001>

<bundles_post_ra>
// kernel: tpu_custom_call.1
= control target key start
LH: loop header
LB: loop body
LE: loop exit
PB: predicated region body
PF: predicated region fallthrough
CT: control target
= control target key end

     0   :  { %s919_s0 = inlined_call_operand.vmem [shape: f32[2], index: 0, kind: input, shape index: {}]   ;;  %s920_s1 = inlined_call_operand.vmem [shape: f32[2,2,128], index: 1, kind: input, shape index: {}]   ;;  %s921_s2 = inlined_call_operand.vmem [shape: f32[2,2,128], index: 2, kind: input, shape index: {}]   ;;  %s922_s3 = inlined_call_operand.vmem [shape: f32[2,2,8], index: 3, kind: input, shape index: {}]   ;;  %s923_s4 = inlined_call_operand.vmem [shape: f32[2,128,8], index: 4, kind: input, shape index: {}]   ;;  %s924_s5 = inlined_call_operand.hbm [shape: f32[2,1,128], index: 5, kind: output, shape index: {}]  }
   0x1   :  { %925 = sst [smem:[#allocation9_spill]] %s919_s0 }
   0x2   :  { %10 = vsyncpa [#allocation5], 0 }
   0x3   :  { %11 = vsyncpa [#allocation4], 0 }
   0x4   :  { %13 = vsyncpa [#allocation4 + $0x1], 0  ;;  %s769_s18 = smov 0   ;;  %s771_s19 = smov 0  }
   0x5   :  { %s773_s20 = smov 0   ;;  %s775_s21 = smov 0  }
   0x6   :  { %s777_s22 = smov 0   ;;  %s779_s23 = smov 0  }
   0x7 LB: > { %s550_s24 = sadd.s32 4294967295, %s735_s23   ;;  %s551_s25 = sadd.s32 4294967294, %s735_s23   ;;  %s735_s23 = sphi %s779_s23, %s19_s23   ;;  %s731_s22 = sphi %s777_s22, %s935_s22   ;;  %s727_s21 = sphi %s775_s21, %s934_s21   ;;  %s723_s20 = sphi %s773_s20, %s933_s20   ;;  %s719_s19 = sphi %s771_s19, %s932_s19   ;;  %s715_s18 = sphi %s769_s18, %s931_s18  }
   0x8   : > { %s31_s26 = sadd.s32 1, %s731_s22  ;;  %s169_s27 = sadd.s32 1, %s723_s20 }
   0x9   : > { %p33_p0 = scmp.ge.s32.totalorder %s31_s26, 2  ;;  %p179_p1 = scmp.ne.s32.totalorder %s723_s20, %s719_s19 }
   0xa   : > { %p180_p2 = scmp.eq.s32.totalorder %s550_s24, 1  ;;  %p185_p3 = scmp.ne.s32.totalorder %s719_s19, %s715_s18 }
   0xb   : > { %s937_s26 = smov (%p33_p0, %s31_s26), 0  ;;  %p186_p5 = scmp.eq.s32.totalorder %s551_s25, 1 }
   0xc   : > { %p809_p4 = por %p180_p2, %p179_p1  ;;  %s166_s29 = ssub.s32 %s731_s22, %s937_s26 }
   0xd   : > { %p552_p6 = scmp.ge.s32.totalorder %s735_s23, 1  ;;  %p167_p7 = scmp.eq.s32.totalorder %s166_s29, 0 }
   0xe   : > { %p816_p8 = por %p186_p5, %p185_p3  ;;  %p193_p9 = scmp.lt.s32.totalorder %s735_s23, 3 }
   0xf   : > { %s822_s6 = scalar_select %p167_p7, %s723_s20, %s169_s27  }
  0x10   : > { %p194_p10 = pnand %p552_p6, %p193_p9  ;;  %p581_p11 = scmp.eq.s32.totalorder %s550_s24, 0 }
  0x11   : > { %s928_s0 = sld [smem:[#allocation9_spill]]  ;;  %s737_s10 = smov [#allocation3]  }
  0x12   : > { %p573_p12 = pneg %p194_p10 }
  0x14   : > { %p574_p13 = pnand %p581_p11, %p573_p12  ;;  %256 = sbr.rel (%p194_p10) target bundleno = 396 (0x18c), region = 40 }
  0x17   : > { %s205_s9 = sshll.u32 %s928_s0, 4  ;;  %s206_s9 = int_to_ptr.vmem [resolvable:$true] %s205_s9 }
  0x18   : > { %576 = dma.vmem_to_smem (!%p574_p13), %s206_s9, 16, %s737_s10, [#allocation5]  }
  0x19   : > { %706 = dma.done.wait (%p581_p11), [#allocation5], 16  }
  0x1a   : > { %708 = vsyncadd (%p581_p11), [#allocation5], 4294967280 }
  0x1b   : > { %263 = sfence }
  0x1c   : > { %p306_p0 = scmp.lt.s32.totalorder %s727_s21, 1  ;;  %s738_s13 = smov 0.0  }
  0x1d   : > { %337 = sst [smem:[#allocation2]] %s738_s13 }
  0x1e   : > { %s307_s12 = scalar_select %p306_p0, %s727_s21, 1 }
  0x1f   : > { %s850_s0 = sld [smem:[#allocation3 + %s727_s21]] }
  0x20   : > { %s830_s14 = sshll.u32 %s307_s12, 1  ;;  %s564_s15 = sshll.u32 %s307_s12, 7 }
  0x21   : > { %s312_s24 = scalar_lea.vmem %s920_s1, %s830_s14  ;;  %s319_s29 = scalar_lea.vmem %s921_s2, %s830_s14 }
  0x22   : > { %s326_s9 = scalar_lea.vmem %s922_s3, %s830_s14  ;;  %s847_s11 = scalar_lea.vmem %s923_s4, %s564_s15 }
  0x23   : > { %s929_s12 = sand.u32 1, %s719_s19  }
  0x24   : > { %s855_s16 = scalar_lea.vmem [#allocation6], %s929_s12 }
  0x25   : > { %p339_p1 = scmp.ne.f32.partialorder %s850_s0, 0.0 }
  0x26   : > { %v373_v0 = vld [vmem:[%s847_s11 + $0x78] sm:$0xff] (%p339_p1)  ;;  %v372_v1 = vld [vmem:[%s847_s11 + $0x70] sm:$0xff] (%p339_p1)  ;;  %v371_v2 = vld [vmem:[%s847_s11 + $0x68] sm:$0xff] (%p339_p1)  ;;  %vm396_vm0 = vcmask (%p339_p1), 58368  }
  0x27   : > { %342 = sbr.rel (!%p339_p1) target bundleno = 382 (0x17e), region = 52  ;;  %374 = vmatpush.msra.mxu0 (%p339_p1), %v373_v0  ;;  %v370_v3 = vld [vmem:[%s847_s11 + $0x60] sm:$0xff] (%p339_p1)  ;;  %v369_v5 = vld [vmem:[%s847_s11 + $0x58] sm:$0xff] (%p339_p1)  ;;  %v368_v7 = vld [vmem:[%s847_s11 + $0x50] sm:$0xff] (%p339_p1) }
  0x28   : > { %v343_v4 = vld [vmem:[%s312_s24] sm:$0x3] (%p339_p1)  ;;  %v367_v8 = vld [vmem:[%s847_s11 + $0x48] sm:$0xff] (%p339_p1)  ;;  %v365_v14 = vld [vmem:[%s847_s11 + $0x38] sm:$0xff] (%p339_p1) }
  0x29   : > { %375 = vmatpush.msra.mxu0 (%p339_p1), %v372_v1  ;;  %634 = vlog2.f32 (%p339_p1), %v343_v4  ;;  %v349_v6 = vsub.f32 (%p339_p1), 1.0, %v343_v4  ;;  %v366_v10 = vld [vmem:[%s847_s11 + $0x40] sm:$0xff] (%p339_p1)  ;;  %v364_v16 = vld [vmem:[%s847_s11 + $0x30] sm:$0xff] (%p339_p1)  ;;  %v363_v20 = vld [vmem:[%s847_s11 + $0x28] sm:$0xff] (%p339_p1) }
  0x2a   : > { %v344_v11 = vld [vmem:[%s319_s29] sm:$0x3] (%p339_p1)  ;;  %v361_v24 = vld [vmem:[%s847_s11 + $0x18] sm:$0xff] (%p339_p1)  ;;  %v360_v25 = vld [vmem:[%s847_s11 + $0x10] sm:$0xff] (%p339_p1) }
  0x2b   : > { %376 = vmatpush.msra.mxu0 (%p339_p1), %v371_v2  ;;  %636 = vlog2.f32 (%p339_p1), %v349_v6  ;;  %v354_v18 = vsub.f32 (%p339_p1), 1.0, %v344_v11  ;;  %v362_v21 = vld [vmem:[%s847_s11 + $0x20] sm:$0xff] (%p339_p1)  ;;  %v359_v27 = vld [vmem:[%s847_s11 + $0x8] sm:$0xff] (%p339_p1) }
  0x2c   : > { %v358_v28 = vld [vmem:[%s847_s11] sm:$0xff]  ;;  %s394_s11 = sld [smem:[#allocation2]] }
  0x2d   : > { %377 = vmatpush.msra.mxu0 %v370_v3  ;;  %v345_v30 = vld [vmem:[%s326_s9] sm:$0x3] }
  0x2f   : > { %378 = vmatpush.msra.mxu0 %v369_v5  ;;  %v635_v9 = vpop.eup %634 }
  0x30   : > { %v347_v12 = vmul.f32 0.6931472, %v635_v9 }
  0x31   : > { %379 = vmatpush.msra.mxu0 %v368_v7  ;;  %v637_v13 = vpop.eup %636 }
  0x32   : > { %v351_v15 = vmul.f32 0.6931472, %v637_v13  ;;  %v348_v17 = vmax.f32 %v347_v12, -100.0 }
  0x33   : > { %380 = vmatpush.msra.mxu0 %v367_v8 }
  0x34   : > { %v352_v19 = vmax.f32 %v351_v15, -100.0  ;;  %v353_v22 = vmul.f32 %v348_v17, %v344_v11 }
  0x35   : > { %381 = vmatpush.msra.mxu0 %v366_v10 }
  0x36   : > { %v355_v23 = vmul.f32 %v354_v18, %v352_v19 }
  0x37   : > { %382 = vmatpush.msra.mxu0 %v365_v14 }
  0x38   : > { %v356_v26 = vadd.f32 %v355_v23, %v353_v22 }
  0x39   : > { %383 = vmatpush.msra.mxu0 %v364_v16 }
  0x3a   : > { %v357_v29 = vsub.f32 0.0, %v356_v26 }
  0x3b   : > { %384 = vmatpush.msra.mxu0 %v363_v20 }
  0x3d   : > { %385 = vmatpush.msra.mxu0 %v362_v21 }
  0x3f   : > { %386 = vmatpush.msra.mxu0 %v361_v24 }
  0x41   : > { %387 = vmatpush.msra.mxu0 %v360_v25 }
  0x43   : > { %388 = vmatpush.msra.mxu0 %v359_v27 }
  0x45   : > { %389 = vmatpush.msra.mxu0 %v358_v28 }
  0x46   : > { %390 = vmatmul.f32.vlgmr.msra.gmra.mxu0 %v357_v29 }
  0xc3   : > { %v391_v31 = vpop.f32.mrf.mxu0 }
  0xc4   : > { %v395_v32 = vmul.f32 %v391_v31, %v345_v30 }
  0xc6   : > { %v397_v33 = vsel %vm396_vm0, %v395_v32, 0.0 }
  0xc7   : > { %398 = vadd.xlane.f32.xlu0 %v397_v33 }
 0x13a   : > { %v399_v34 = vpop.xlane.xlu0 %398 }
 0x13b   : > { %v400_v35 = vrot.slane %v399_v34, 4 }
 0x13d   : > { %v401_v36 = vadd.f32 %v400_v35, %v399_v34 }
 0x13f   : > { %v402_v37 = vrot.slane %v401_v36, 2 }
 0x141   : > { %v403_v38 = vadd.f32 %v402_v37, %v401_v36 }
 0x143   : > { %v404_v39 = vrot.slane %v403_v38, 1 }
 0x145   : > { %v405_v40 = vadd.f32 %v404_v39, %v403_v38 }
 0x147   : > { %565 = vpush %v405_v40 }
 0x178   : > { %s566_s24 = spop %565 }
 0x179   : > { %s407_s25 = smul.f32 %s566_s24, %s850_s0 }
 0x17b   : > { %s408_s27 = sadd.f32 %s407_s25, %s394_s11 }
 0x17d   : > { %410 = sst [smem:[#allocation2]] %s408_s27 }
 0x17e PF: > { %s414_s14 = sld [smem:[#allocation2]]  ;;  %s426_s8 = scalar_lea.hbm %s924_s5, %s727_s21 }
 0x17f   : > { %s428_s9 = sshll.u32 %s855_s16, 4  ;;  %s430_s10 = sshll.u32 %s426_s8, 4  ;;  %s429_s9 = int_to_ptr.vmem [resolvable:$true] %s428_s9  ;;  %s431_s10 = int_to_ptr.hbm [resolvable:$true] %s430_s10 }
 0x180   : > { %s930_s0 = sand.u32 1, %s719_s19   ;;  %s667_s12 = sshra.s32 %s431_s10, 4  ;;  %s668_s12 = int_to_ptr.hbm [resolvable:$true] %s667_s12 }
 0x181   : > { %s418_s13 = scalar_lea.sflag [#allocation4], %s930_s0  ;;  %s669_s15 = scalar_lea.hbm %s668_s12, 1 }
 0x182   : > { %p670_p2 = scmp.ne.s32.totalorder %s668_s12, %s669_s15  ;;  %s673_s24 = scalar_lea.hbm %s924_s5, 2 }
 0x183   : > { %p674_p6 = scmp.lt.s32.totalorder %s668_s12, %s924_s5  ;;  %p675_p7 = scmp.lt.s32.totalorder %s673_s24, %s669_s15 }
 0x184   : > { %v415_v41 = vstv %s414_s14  ;;  %p671_p3 = pnand %p670_p2, %p809_p4 }
 0x185   : > { %416 = vst [vmem:[%s855_s16] sm:$0x1] %v415_v41  ;;  %p676_p9 = por %p675_p7, %p674_p6 }
 0x186   : > { %p672_p5 = pneg %p671_p3 }
 0x188   : > { %p677_p10 = pnand %p676_p9, %p672_p5 }
 0x18a   : > { %680 = shalt.err (!%p677_p10)
}
 0x18b   : > { %571 = dma.vmem_to_hbm [thread:$0]  (%p809_p4), %s429_s9, 16, %s431_s10, %s418_s13  }
 0x18c PF: > { %p583_p11 = scmp.ge.s32.totalorder %s735_s23, 2  ;;  %s442_s16 = sand.u32 1, %s715_s18  }
 0x18d   : > { %s443_s27 = scalar_lea.sflag [#allocation4], %s442_s16 }
 0x18e   : > { %p578_p12 = pnand %p583_p11, %p816_p8 }
 0x190   : > { %p579_p13 = pneg %p578_p12 }
 0x192   : > { %710 = dma.done.wait (%p579_p13), %s443_s27, 16  }
 0x193   : > { %712 = vsyncadd (%p579_p13), %s443_s27, 4294967280  ;;  %s19_s23 = sadd.s32 1, %s735_s23   ;;  %s931_s18 = smov %s719_s19 }
 0x194   : > { %p16_p0 = scmp.ge.s32.totalorder %s19_s23, 4   ;;  %s932_s19 = smov %s723_s20 }
 0x195   : > { %s933_s20 = smov %s822_s6  ;;  %s934_s21 = smov %s731_s22 }
 0x196   : > { %s935_s22 = smov %s937_s26  ;;  %18 = sbr.rel (!%p16_p0) target bundleno = 7 (0x7), region = 103 }
 0x19b   :  { %448 = vsyncpa [#allocation4], 1 }
 0x19c   :  { %450 = vsyncpa [#allocation4 + $0x1], 1 }
 0x19d   :  { %451 = vsyncpa [#allocation5], 1 }
 0x19e   :  { %453 = vsyncpa [#allocation5 + $0x1], 1 }

</bundles_post_ra>
